<compile_context>
chip_gen: v5e
topology: v5e:2x2
jax: 0.10.0
libtpu: 0.0.40
codegen_flags: <defaults>
</compile_context>

<pallas_src>
import jax
import jax.numpy as jnp
from jax import lax
from jax.experimental import pallas as pl
from jax.experimental.pallas import tpu as pltpu

EPS = 1e-5
NEG_SLOPE = 0.1


def _round_up(n, m):
    return (n + m - 1) // m * m


def _choose_tk(B, D_pad, NB_pad, budget_bytes=16 * 1024 * 1024):
    """Largest 128-multiple K tile dividing D_pad whose double-buffered input
    slabs (x: (B,tk) f32, w1: (tk,NB_pad) bf16) stay inside `budget_bytes`,
    leaving the rest of the 32 MiB default scoped VMEM for the resident
    accumulator, outputs and w2 (v7x-safe)."""
    for tk in (2048, 1024, 512, 256, 128):
        if D_pad % tk:
            continue
        per_buf = B * tk * 4 + tk * NB_pad * 2
        if 2 * per_buf <= budget_bytes:
            return tk
    return 128


def classblock1_kernel(x_ref, g1_ref, b1_ref, w1_ref, g2_ref, b2_ref, w2_ref,
                       out_x_ref, out_x1_ref, out_x2_ref, acc_ref):
    k = pl.program_id(0)
    nk = pl.num_programs(0)

    @pl.when(k == 0)
    def _():
        acc_ref[...] = jnp.zeros_like(acc_ref)

    x = x_ref[...]                                   # (B, tk) f32
    inv_n = 1.0 / x.shape[0]

    # ---- BN1 (training-mode batch stats); per-feature => exact per K tile.
    # One-pass stats + fused affine: xn = x*scale1 + shift1.
    s1 = jnp.sum(x, axis=0, keepdims=True)
    s2 = jnp.sum(x * x, axis=0, keepdims=True)
    mean1 = s1 * inv_n
    var1 = jnp.maximum(s2 * inv_n - mean1 * mean1, 0.0)     # biased var
    scale1 = g1_ref[...] * lax.rsqrt(var1 + EPS)            # rsqrt -> EUP
    shift1 = b1_ref[...] - mean1 * scale1
    xn = x * scale1 + shift1

    # ---- LeakyReLU(0.1) ----
    xr = jnp.where(xn >= 0.0, xn, NEG_SLOPE * xn)

    # ---- Linear(input_dim -> NB, no bias): partial product for this K tile.
    # bf16 MXU operands, f32 accumulation.
    acc_ref[...] += jnp.dot(xr.astype(jnp.bfloat16), w1_ref[...],
                            preferred_element_type=jnp.float32)

    @pl.when(k == nk - 1)
    def _():
        h = acc_ref[...]                             # (B, NB_pad) f32
        out_x_ref[...] = h

        # ---- BN2 (batch stats, one-pass, fused affine) ----
        s1h = jnp.sum(h, axis=0, keepdims=True)
        s2h = jnp.sum(h * h, axis=0, keepdims=True)
        mean2 = s1h * inv_n
        var2 = jnp.maximum(s2h * inv_n - mean2 * mean2, 0.0)
        scale2 = g2_ref[...] * lax.rsqrt(var2 + EPS)
        shift2 = b2_ref[...] - mean2 * scale2
        h1 = h * scale2 + shift2
        out_x1_ref[...] = h1

        # ---- classifier Linear(NB -> class_num, no bias) ----
        out_x2_ref[...] = jnp.dot(h1.astype(jnp.bfloat16), w2_ref[...],
                                  preferred_element_type=jnp.float32)


@jax.jit
def classblock1(x, g1, b1, w1, g2, b2, w2):
    """x: (B, D). g1,b1: (1, D). w1: (D, NB). g2,b2: (1, NB). w2: (NB, C)."""
    B, D = x.shape
    NB = w1.shape[1]
    C = w2.shape[1]

    # Pad feature dims to multiples of 128: lane-dense outputs (unmasked vst),
    # full MXU tiles.  Zero padding keeps padded columns exactly zero end to
    # end, so slicing the outputs recovers the exact un-padded result.
    D_pad = _round_up(D, 128)
    NB_pad = _round_up(NB, 128)
    C_pad = _round_up(C, 128)

    xp = jnp.pad(x, ((0, 0), (0, D_pad - D)))
    g1p = jnp.pad(g1, ((0, 0), (0, D_pad - D)))
    b1p = jnp.pad(b1, ((0, 0), (0, D_pad - D)))
    w1p = jnp.pad(w1, ((0, D_pad - D), (0, NB_pad - NB))).astype(jnp.bfloat16)
    g2p = jnp.pad(g2, ((0, 0), (0, NB_pad - NB)))
    b2p = jnp.pad(b2, ((0, 0), (0, NB_pad - NB)))
    w2p = jnp.pad(w2, ((0, NB_pad - NB), (0, C_pad - C))).astype(jnp.bfloat16)

    tk = _choose_tk(B, D_pad, NB_pad)
    nk = D_pad // tk

    flops = (2 * B * D_pad * NB_pad + 2 * B * NB_pad * C_pad
             + 12 * B * (D_pad + NB_pad))
    bytes_accessed = (4 * (xp.size + g1p.size + b1p.size + g2p.size + b2p.size)
                      + 2 * (w1p.size + w2p.size)
                      + 4 * (2 * B * NB_pad + B * C_pad))

    out_x, out_x1, out_x2 = pl.pallas_call(
        classblock1_kernel,
        out_shape=(
            jax.ShapeDtypeStruct((B, NB_pad), jnp.float32),  # x  (add_block1)
            jax.ShapeDtypeStruct((B, NB_pad), jnp.float32),  # x1 (add_block2)
            jax.ShapeDtypeStruct((B, C_pad), jnp.float32),   # x2 (classifier)
        ),
        grid_spec=pltpu.PrefetchScalarGridSpec(
            num_scalar_prefetch=0,
            grid=(nk,),
            in_specs=[
                pl.BlockSpec((B, tk), lambda k: (0, k)),          # x slab
                pl.BlockSpec((1, tk), lambda k: (0, k)),          # gamma1 slab
                pl.BlockSpec((1, tk), lambda k: (0, k)),          # beta1 slab
                pl.BlockSpec((tk, NB_pad), lambda k: (k, 0)),     # w1 slab
                pl.BlockSpec((1, NB_pad), lambda k: (0, 0)),      # gamma2
                pl.BlockSpec((1, NB_pad), lambda k: (0, 0)),      # beta2
                pl.BlockSpec((NB_pad, C_pad), lambda k: (0, 0)),  # w2
            ],
            out_specs=(
                pl.BlockSpec((B, NB_pad), lambda k: (0, 0)),
                pl.BlockSpec((B, NB_pad), lambda k: (0, 0)),
                pl.BlockSpec((B, C_pad), lambda k: (0, 0)),
            ),
            scratch_shapes=[pltpu.VMEM((B, NB_pad), jnp.float32)],
        ),
        compiler_params=pltpu.CompilerParams(
            dimension_semantics=("arbitrary",),   # K is a reduction axis
        ),
        cost_estimate=pl.CostEstimate(
            flops=flops,
            transcendentals=D_pad + NB_pad,
            bytes_accessed=bytes_accessed,
        ),
    )(xp, g1p, b1p, w1p, g2p, b2p, w2p)

    return out_x[:, :NB], out_x1[:, :NB], out_x2[:, :C]


def init_params(key, input_dim, num_bottleneck, class_num):
    k1, k2, k3, k4 = jax.random.split(key, 4)
    # BatchNorm1d: weights_init_kaiming -> gamma ~ N(1, 0.02), beta = 0
    g1 = 1.0 + 0.02 * jax.random.normal(k1, (1, input_dim), jnp.float32)
    b1 = jnp.zeros((1, input_dim), jnp.float32)
    g2 = 1.0 + 0.02 * jax.random.normal(k2, (1, num_bottleneck), jnp.float32)
    b2 = jnp.zeros((1, num_bottleneck), jnp.float32)
    # Linear(input_dim, NB, bias=False): kaiming_normal, mode='fan_out'
    #   std = sqrt(2 / out_features); stored pre-transposed as (in, out)
    std1 = (2.0 / num_bottleneck) ** 0.5
    w1 = std1 * jax.random.normal(k3, (input_dim, num_bottleneck), jnp.float32)
    # classifier Linear: init.normal(std=0.001); stored (in, out)
    w2 = 0.001 * jax.random.normal(k4, (num_bottleneck, class_num), jnp.float32)
    return g1, b1, w1, g2, b2, w2


def reference(x, g1, b1, w1, g2, b2, w2):
    """PyTorch-faithful f32 reference (training-mode BN, biased variance)."""
    m1 = jnp.mean(x, axis=0, keepdims=True)
    v1 = jnp.mean((x - m1) ** 2, axis=0, keepdims=True)
    xn = (x - m1) / jnp.sqrt(v1 + EPS) * g1 + b1
    xr = jnp.where(xn >= 0, xn, NEG_SLOPE * xn)
    h = xr @ w1
    m2 = jnp.mean(h, axis=0, keepdims=True)
    v2 = jnp.mean((h - m2) ** 2, axis=0, keepdims=True)
    h1 = (h - m2) / jnp.sqrt(v2 + EPS) * g2 + b2
    return h, h1, h1 @ w2


if __name__ == "__main__":
    B, INPUT_DIM, NUM_BOTTLENECK, CLASS_NUM = 8, 32, 64, 16

    key = jax.random.PRNGKey(0)
    kx, kp = jax.random.split(key)
    x = jax.random.normal(kx, (B, INPUT_DIM), jnp.float32)
    params = init_params(kp, INPUT_DIM, NUM_BOTTLENECK, CLASS_NUM)

    out_x, out_x1, out_x2 = classblock1(x, *params)
    jax.block_until_ready((out_x, out_x1, out_x2))

    ref_x, ref_x1, ref_x2 = reference(x, *params)
    # Tolerances account for bf16 MXU operands (f32 accumulation) and
    # one-pass batch-variance; structural errors are orders of magnitude larger.
    assert out_x.shape == (B, NUM_BOTTLENECK)
    assert out_x1.shape == (B, NUM_BOTTLENECK)
    assert out_x2.shape == (B, CLASS_NUM)
    assert jnp.allclose(out_x, ref_x, atol=3e-2, rtol=3e-2)
    assert jnp.allclose(out_x1, ref_x1, atol=5e-2, rtol=5e-2)
    assert jnp.allclose(out_x2, ref_x2, atol=3e-3, rtol=5e-2)

    print("KERNEL_OK")
</pallas_src>

<mosaic_0001>
module attributes {stable_mosaic.version = 11 : i64} {
  func.func @classblock1_kernel(%arg0: i32, %arg1: memref<8x128xf32, #tpu.memory_space<vmem>>, %arg2: memref<1x128xf32, #tpu.memory_space<vmem>>, %arg3: memref<1x128xf32, #tpu.memory_space<vmem>>, %arg4: memref<128x128xbf16, #tpu.memory_space<vmem>>, %arg5: memref<1x128xf32, #tpu.memory_space<vmem>>, %arg6: memref<1x128xf32, #tpu.memory_space<vmem>>, %arg7: memref<128x128xbf16, #tpu.memory_space<vmem>>, %arg8: memref<8x128xf32, #tpu.memory_space<vmem>>, %arg9: memref<8x128xf32, #tpu.memory_space<vmem>>, %arg10: memref<8x128xf32, #tpu.memory_space<vmem>>, %arg11: memref<8x128xf32, #tpu.memory_space<vmem>>) attributes {dimension_semantics = [#tpu.dimension_semantics<arbitrary>], iteration_bounds = array<i64: 1>, scalar_prefetch = 0 : i64, scratch_operands = 1 : i64, tpu.core_type = #tpu.core_type<tc>, window_params = [{transform_indices = @transform_0, window_bounds = array<i64: 8, 128>}, {transform_indices = @transform_1, window_bounds = array<i64: 1, 128>}, {transform_indices = @transform_2, window_bounds = array<i64: 1, 128>}, {transform_indices = @transform_3, window_bounds = array<i64: 128, 128>}, {pipeline_mode = #tpu.pipeline_mode<synchronous>, transform_indices = @transform_4, window_bounds = array<i64: 1, 128>}, {pipeline_mode = #tpu.pipeline_mode<synchronous>, transform_indices = @transform_5, window_bounds = array<i64: 1, 128>}, {pipeline_mode = #tpu.pipeline_mode<synchronous>, transform_indices = @transform_6, window_bounds = array<i64: 128, 128>}, {pipeline_mode = #tpu.pipeline_mode<synchronous>, transform_indices = @transform_7, window_bounds = array<i64: 8, 128>}, {pipeline_mode = #tpu.pipeline_mode<synchronous>, transform_indices = @transform_8, window_bounds = array<i64: 8, 128>}, {pipeline_mode = #tpu.pipeline_mode<synchronous>, transform_indices = @transform_9, window_bounds = array<i64: 8, 128>}]} {
    %c0_i32 = arith.constant 0 : i32
    %0 = arith.cmpi eq, %arg0, %c0_i32 : i32
    %1 = arith.extui %0 : i1 to i32
    %c0_i32_0 = arith.constant 0 : i32
    %2 = arith.cmpi ne, %1, %c0_i32_0 : i32
    scf.if %2 {
      %cst_22 = arith.constant 0.000000e+00 : f32
      %43 = vector.broadcast %cst_22 : f32 to vector<8x128xf32>
      %c0_23 = arith.constant 0 : index
      %c0_24 = arith.constant 0 : index
      %44 = vector.load %arg11[%c0_23, %c0_24] : memref<8x128xf32, #tpu.memory_space<vmem>>, vector<8x128xf32>
      tpu.vector_store %arg11[%c0_23, %c0_24], %43 {strides = array<i32>} : memref<8x128xf32, #tpu.memory_space<vmem>>, vector<8x128xf32>,
    } else {
    }
    %c0 = arith.constant 0 : index
    %c0_1 = arith.constant 0 : index
    %3 = vector.load %arg1[%c0, %c0_1] : memref<8x128xf32, #tpu.memory_space<vmem>>, vector<8x128xf32>
    %cst = arith.constant dense<0.000000e+00> : vector<128xf32>
    %4 = vector.multi_reduction <add>, %3, %cst [0] : vector<8x128xf32> to vector<128xf32>
    %5 = vector.shape_cast %4 : vector<128xf32> to vector<1x128xf32>
    %6 = arith.mulf %3, %3 : vector<8x128xf32>
    %cst_2 = arith.constant dense<0.000000e+00> : vector<128xf32>
    %7 = vector.multi_reduction <add>, %6, %cst_2 [0] : vector<8x128xf32> to vector<128xf32>
    %8 = vector.shape_cast %7 : vector<128xf32> to vector<1x128xf32>
    %cst_3 = arith.constant 1.250000e-01 : f32
    %9 = vector.broadcast %cst_3 : f32 to vector<1x128xf32>
    %10 = arith.mulf %5, %9 : vector<1x128xf32>
    %cst_4 = arith.constant 1.250000e-01 : f32
    %11 = vector.broadcast %cst_4 : f32 to vector<1x128xf32>
    %12 = arith.mulf %8, %11 : vector<1x128xf32>
    %13 = arith.mulf %10, %10 : vector<1x128xf32>
    %14 = arith.subf %12, %13 : vector<1x128xf32>
    %cst_5 = arith.constant 0.000000e+00 : f32
    %15 = vector.broadcast %cst_5 : f32 to vector<1x128xf32>
    %16 = arith.maximumf %14, %15 : vector<1x128xf32>
    %c0_6 = arith.constant 0 : index
    %c0_7 = arith.constant 0 : index
    %17 = vector.load %arg2[%c0_6, %c0_7] : memref<1x128xf32, #tpu.memory_space<vmem>>, vector<1x128xf32>
    %cst_8 = arith.constant 9.99999974E-6 : f32
    %18 = vector.broadcast %cst_8 : f32 to vector<1x128xf32>
    %19 = arith.addf %16, %18 : vector<1x128xf32>
    %20 = math.rsqrt %19 : vector<1x128xf32>
    %21 = arith.mulf %17, %20 : vector<1x128xf32>
    %c0_9 = arith.constant 0 : index
    %c0_10 = arith.constant 0 : index
    %22 = vector.load %arg3[%c0_9, %c0_10] : memref<1x128xf32, #tpu.memory_space<vmem>>, vector<1x128xf32>
    %23 = arith.mulf %10, %21 : vector<1x128xf32>
    %24 = arith.subf %22, %23 : vector<1x128xf32>
    %25 = vector.broadcast %21 : vector<1x128xf32> to vector<8x128xf32>
    %26 = arith.mulf %3, %25 : vector<8x128xf32>
    %27 = vector.broadcast %24 : vector<1x128xf32> to vector<8x128xf32>
    %28 = arith.addf %26, %27 : vector<8x128xf32>
    %cst_11 = arith.constant 0.000000e+00 : f32
    %29 = vector.broadcast %cst_11 : f32 to vector<8x128xf32>
    %30 = arith.cmpf oge, %28, %29 : vector<8x128xf32>
    %cst_12 = arith.constant 1.000000e-01 : f32
    %31 = vector.broadcast %cst_12 : f32 to vector<8x128xf32>
    %32 = arith.mulf %31, %28 : vector<8x128xf32>
    %33 = arith.select %30, %28, %32 : vector<8x128xi1>, vector<8x128xf32>
    %c0_13 = arith.constant 0 : index
    %c0_14 = arith.constant 0 : index
    %34 = vector.load %arg11[%c0_13, %c0_14] : memref<8x128xf32, #tpu.memory_space<vmem>>, vector<8x128xf32>
    %35 = arith.truncf %33 : vector<8x128xf32> to vector<8x128xbf16>
    %c0_15 = arith.constant 0 : index
    %c0_16 = arith.constant 0 : index
    %36 = vector.load %arg4[%c0_15, %c0_16] : memref<128x128xbf16, #tpu.memory_space<vmem>>, vector<128x128xbf16>
    %cst_17 = arith.constant dense<0.000000e+00> : vector<8x128xf32>
    %37 = tpu.matmul %35, %36, %cst_17 {dimension_numbers = #tpu.dot_dimension_numbers<[1], [0], [0], [1], [0, 0, 1, 1], [], []>} : vector<8x128xbf16>, vector<128x128xbf16>, vector<8x128xf32> -> vector<8x128xf32>
    %38 = arith.addf %34, %37 : vector<8x128xf32>
    %c0_18 = arith.constant 0 : index
    %c0_19 = arith.constant 0 : index
    %39 = vector.load %arg11[%c0_18, %c0_19] : memref<8x128xf32, #tpu.memory_space<vmem>>, vector<8x128xf32>
    tpu.vector_store %arg11[%c0_18, %c0_19], %38 {strides = array<i32>} : memref<8x128xf32, #tpu.memory_space<vmem>>, vector<8x128xf32>,
    %c0_i32_20 = arith.constant 0 : i32
    %40 = arith.cmpi eq, %arg0, %c0_i32_20 : i32
    %41 = arith.extui %40 : i1 to i32
    %c0_i32_21 = arith.constant 0 : i32
    %42 = arith.cmpi ne, %41, %c0_i32_21 : i32
    scf.if %42 {
      %c0_22 = arith.constant 0 : index
      %c0_23 = arith.constant 0 : index
      %43 = vector.load %arg11[%c0_22, %c0_23] : memref<8x128xf32, #tpu.memory_space<vmem>>, vector<8x128xf32>
      %c0_24 = arith.constant 0 : index
      %c0_25 = arith.constant 0 : index
      %44 = vector.load %arg8[%c0_24, %c0_25] : memref<8x128xf32, #tpu.memory_space<vmem>>, vector<8x128xf32>
      tpu.vector_store %arg8[%c0_24, %c0_25], %43 {strides = array<i32>} : memref<8x128xf32, #tpu.memory_space<vmem>>, vector<8x128xf32>,
      %cst_26 = arith.constant dense<0.000000e+00> : vector<128xf32>
      %45 = vector.multi_reduction <add>, %43, %cst_26 [0] : vector<8x128xf32> to vector<128xf32>
      %46 = vector.shape_cast %45 : vector<128xf32> to vector<1x128xf32>
      %47 = arith.mulf %43, %43 : vector<8x128xf32>
      %cst_27 = arith.constant dense<0.000000e+00> : vector<128xf32>
      %48 = vector.multi_reduction <add>, %47, %cst_27 [0] : vector<8x128xf32> to vector<128xf32>
      %49 = vector.shape_cast %48 : vector<128xf32> to vector<1x128xf32>
      %cst_28 = arith.constant 1.250000e-01 : f32
      %50 = vector.broadcast %cst_28 : f32 to vector<1x128xf32>
      %51 = arith.mulf %46, %50 : vector<1x128xf32>
      %cst_29 = arith.constant 1.250000e-01 : f32
      %52 = vector.broadcast %cst_29 : f32 to vector<1x128xf32>
      %53 = arith.mulf %49, %52 : vector<1x128xf32>
      %54 = arith.mulf %51, %51 : vector<1x128xf32>
      %55 = arith.subf %53, %54 : vector<1x128xf32>
      %cst_30 = arith.constant 0.000000e+00 : f32
      %56 = vector.broadcast %cst_30 : f32 to vector<1x128xf32>
      %57 = arith.maximumf %55, %56 : vector<1x128xf32>
      %c0_31 = arith.constant 0 : index
      %c0_32 = arith.constant 0 : index
      %58 = vector.load %arg5[%c0_31, %c0_32] : memref<1x128xf32, #tpu.memory_space<vmem>>, vector<1x128xf32>
      %cst_33 = arith.constant 9.99999974E-6 : f32
      %59 = vector.broadcast %cst_33 : f32 to vector<1x128xf32>
      %60 = arith.addf %57, %59 : vector<1x128xf32>
      %61 = math.rsqrt %60 : vector<1x128xf32>
      %62 = arith.mulf %58, %61 : vector<1x128xf32>
      %c0_34 = arith.constant 0 : index
      %c0_35 = arith.constant 0 : index
      %63 = vector.load %arg6[%c0_34, %c0_35] : memref<1x128xf32, #tpu.memory_space<vmem>>, vector<1x128xf32>
      %64 = arith.mulf %51, %62 : vector<1x128xf32>
      %65 = arith.subf %63, %64 : vector<1x128xf32>
      %66 = vector.broadcast %62 : vector<1x128xf32> to vector<8x128xf32>
      %67 = arith.mulf %43, %66 : vector<8x128xf32>
      %68 = vector.broadcast %65 : vector<1x128xf32> to vector<8x128xf32>
      %69 = arith.addf %67, %68 : vector<8x128xf32>
      %c0_36 = arith.constant 0 : index
      %c0_37 = arith.constant 0 : index
      %70 = vector.load %arg9[%c0_36, %c0_37] : memref<8x128xf32, #tpu.memory_space<vmem>>, vector<8x128xf32>
      tpu.vector_store %arg9[%c0_36, %c0_37], %69 {strides = array<i32>} : memref<8x128xf32, #tpu.memory_space<vmem>>, vector<8x128xf32>,
      %71 = arith.truncf %69 : vector<8x128xf32> to vector<8x128xbf16>
      %c0_38 = arith.constant 0 : index
      %c0_39 = arith.constant 0 : index
      %72 = vector.load %arg7[%c0_38, %c0_39] : memref<128x128xbf16, #tpu.memory_space<vmem>>, vector<128x128xbf16>
      %cst_40 = arith.constant dense<0.000000e+00> : vector<8x128xf32>
      %73 = tpu.matmul %71, %72, %cst_40 {dimension_numbers = #tpu.dot_dimension_numbers<[1], [0], [0], [1], [0, 0, 1, 1], [], []>} : vector<8x128xbf16>, vector<128x128xbf16>, vector<8x128xf32> -> vector<8x128xf32>
      %c0_41 = arith.constant 0 : index
      %c0_42 = arith.constant 0 : index
      %74 = vector.load %arg10[%c0_41, %c0_42] : memref<8x128xf32, #tpu.memory_space<vmem>>, vector<8x128xf32>
      tpu.vector_store %arg10[%c0_41, %c0_42], %73 {strides = array<i32>} : memref<8x128xf32, #tpu.memory_space<vmem>>, vector<8x128xf32>,
    } else {
    }
    return
  }
  func.func @transform_0(%arg0: i32) -> (i32, i32) {
    %c0_i32 = arith.constant 0 : i32
    %c0_i32_0 = arith.constant 0 : i32
    return %c0_i32, %arg0 : i32, i32
  }
  func.func @transform_1(%arg0: i32) -> (i32, i32) {
    %c0_i32 = arith.constant 0 : i32
    %c0_i32_0 = arith.constant 0 : i32
    return %c0_i32, %arg0 : i32, i32
  }
  func.func @transform_2(%arg0: i32) -> (i32, i32) {
    %c0_i32 = arith.constant 0 : i32
    %c0_i32_0 = arith.constant 0 : i32
    return %c0_i32, %arg0 : i32, i32
  }
  func.func @transform_3(%arg0: i32) -> (i32, i32) {
    %c0_i32 = arith.constant 0 : i32
    %c0_i32_0 = arith.constant 0 : i32
    return %arg0, %c0_i32 : i32, i32
  }
  func.func @transform_4(%arg0: i32) -> (i32, i32) {
    %c0_i32 = arith.constant 0 : i32
    %c0_i32_0 = arith.constant 0 : i32
    %c0_i32_1 = arith.constant 0 : i32
    return %c0_i32, %c0_i32_0 : i32, i32
  }
  func.func @transform_5(%arg0: i32) -> (i32, i32) {
    %c0_i32 = arith.constant 0 : i32
    %c0_i32_0 = arith.constant 0 : i32
    %c0_i32_1 = arith.constant 0 : i32
    return %c0_i32, %c0_i32_0 : i32, i32
  }
  func.func @transform_6(%arg0: i32) -> (i32, i32) {
    %c0_i32 = arith.constant 0 : i32
    %c0_i32_0 = arith.constant 0 : i32
    %c0_i32_1 = arith.constant 0 : i32
    return %c0_i32, %c0_i32_0 : i32, i32
  }
  func.func @transform_7(%arg0: i32) -> (i32, i32) {
    %c0_i32 = arith.constant 0 : i32
    %c0_i32_0 = arith.constant 0 : i32
    %c0_i32_1 = arith.constant 0 : i32
    return %c0_i32, %c0_i32_0 : i32, i32
  }
  func.func @transform_8(%arg0: i32) -> (i32, i32) {
    %c0_i32 = arith.constant 0 : i32
    %c0_i32_0 = arith.constant 0 : i32
    %c0_i32_1 = arith.constant 0 : i32
    return %c0_i32, %c0_i32_0 : i32, i32
  }
  func.func @transform_9(%arg0: i32) -> (i32, i32) {
    %c0_i32 = arith.constant 0 : i32
    %c0_i32_0 = arith.constant 0 : i32
    %c0_i32_1 = arith.constant 0 : i32
    return %c0_i32, %c0_i32_0 : i32, i32
  }
}

</mosaic_0001>

<bundles_post_ra>
// kernel: classblock1.1
= control target key start
LH: loop header
LB: loop body
LE: loop exit
PB: predicated region body
PF: predicated region fallthrough
CT: control target
= control target key end

     0   :  { %15 = vsyncpa [#allocation4], 0  ;;  %s625_s0 = inlined_call_operand.vmem [shape: f32[8,128], index: 0, kind: input, shape index: {}]   ;;  %s626_s1 = inlined_call_operand.vmem [shape: f32[1,128], index: 1, kind: input, shape index: {}]   ;;  %s627_s2 = inlined_call_operand.vmem [shape: f32[1,128], index: 2, kind: input, shape index: {}]   ;;  %s628_s3 = inlined_call_operand.vmem [shape: bf16[128,128], index: 3, kind: input, shape index: {}]   ;;  %s629_s4 = inlined_call_operand.vmem [shape: f32[1,128], index: 4, kind: input, shape index: {}]   ;;  %s630_s5 = inlined_call_operand.vmem [shape: f32[1,128], index: 5, kind: input, shape index: {}]   ;;  %s631_s6 = inlined_call_operand.vmem [shape: bf16[128,128], index: 6, kind: input, shape index: {}]   ;;  %s632_s7 = inlined_call_operand.hbm [shape: f32[8,128], index: 7, kind: output, shape index: {0}]   ;;  %s633_s8 = inlined_call_operand.hbm [shape: f32[8,128], index: 8, kind: output, shape index: {1}]   ;;  %s634_s9 = inlined_call_operand.hbm [shape: f32[8,128], index: 9, kind: output, shape index: {2}]  }
   0x1   :  { %v408_v0 = vld [vmem:[%s628_s3 + $0x38] sm:$0xff]  ;;  %v407_v1 = vld [vmem:[%s628_s3 + $0x30] sm:$0xff]  ;;  %v36_v2 = vld [vmem:[%s625_s0] sm:$0xff] }
   0x2   :  { %148 = vmatpush.bf16.msra.mxu0 %v408_v0  ;;  %v37_v3 = vrot.slane %v36_v2, 4  ;;  %v43_v4 = vmul.f32 %v36_v2, %v36_v2 }
   0x3   :  { %16 = vsyncpa [#allocation6], 0  ;;  %v406_v7 = vld [vmem:[%s628_s3 + $0x28] sm:$0xff]  ;;  %v405_v12 = vld [vmem:[%s628_s3 + $0x20] sm:$0xff]  ;;  %s500_s26 = smov [#allocation5]   ;;  %s501_s28 = smov [#allocation3]  }
   0x4   :  { %v38_v5 = vadd.f32 %v37_v3, %v36_v2  ;;  %v44_v6 = vrot.slane %v43_v4, 4  ;;  %v404_v17 = vld [vmem:[%s628_s3 + $0x18] sm:$0xff]  ;;  %v403_v22 = vld [vmem:[%s628_s3 + $0x10] sm:$0xff]  ;;  %v402_v25 = vld [vmem:[%s628_s3 + $0x8] sm:$0xff]  ;;  %s306_s27 = sshll.u32 %s500_s26, 4  ;;  %s502_s30 = smov [#allocation7]   ;;  %s307_s27 = int_to_ptr.vmem [resolvable:$true] %s306_s27 }
   0x5   :  { %v401_v27 = vld [vmem:[%s628_s3] sm:$0xff]  ;;  %v416_v47 = vld [vmem:[%s631_s6 + $0x38] sm:$0xff]  ;;  %v415_v48 = vld [vmem:[%s631_s6 + $0x30] sm:$0xff]  ;;  %s317_s10 = sshll.u32 %s502_s30, 4  ;;  %s318_s10 = int_to_ptr.vmem [resolvable:$true] %s317_s10 }
   0x6   :  { %149 = vmatpush.bf16.msra.mxu0 %v407_v1  ;;  %v39_v8 = vrot.slane %v38_v5, 2  ;;  %v45_v9 = vadd.f32 %v44_v6, %v43_v4  ;;  %v55_v33 = vld [vmem:[%s626_s1] sm:$0x1]  ;;  %276 = vmatpush.bf16.msra.mxu1 %v416_v47  ;;  %v414_v49 = vld [vmem:[%s631_s6 + $0x28] sm:$0xff]  ;;  %v412_v51 = vld [vmem:[%s631_s6 + $0x18] sm:$0xff]  ;;  %s297_s1 = sshll.u32 %s632_s7, 4  ;;  %s298_s1 = int_to_ptr.hbm [resolvable:$true] %s297_s1 }
   0x7   :  { %v68_v37 = vld [vmem:[%s627_s2] sm:$0x1]  ;;  %v411_v55 = vld [vmem:[%s631_s6 + $0x10] sm:$0xff]  ;;  %v410_v60 = vld [vmem:[%s631_s6 + $0x8] sm:$0xff] }
   0x8   :  { %v40_v10 = vadd.f32 %v39_v8, %v38_v5  ;;  %v46_v11 = vrot.slane %v45_v9, 2  ;;  %v413_v50 = vld [vmem:[%s631_s6 + $0x20] sm:$0xff] }
   0x9   :  { %v409_v1 = vld [vmem:[%s631_s6] sm:$0xff] }
   0xa   :  { %150 = vmatpush.bf16.msra.mxu0 %v406_v7  ;;  %v41_v13 = vrot.slane %v40_v10, 1  ;;  %v47_v14 = vadd.f32 %v46_v11, %v45_v9  ;;  %277 = vmatpush.bf16.msra.mxu1 %v415_v48 }
   0xc   :  { %v42_v15 = vadd.f32 %v41_v13, %v40_v10  ;;  %v48_v16 = vrot.slane %v47_v14, 1 }
   0xe   :  { %151 = vmatpush.bf16.msra.mxu0 %v405_v12  ;;  %v49_v18 = vadd.f32 %v48_v16, %v47_v14  ;;  %v50_v19 = vmul.f32 0.125, %v42_v15  ;;  %278 = vmatpush.bf16.msra.mxu1 %v414_v49 }
  0x10   :  { %v51_v20 = vmul.f32 0.125, %v49_v18  ;;  %v52_v21 = vmul.f32 %v50_v19, %v50_v19 }
  0x12   :  { %152 = vmatpush.bf16.msra.mxu0 %v404_v17  ;;  %v53_v23 = vsub.f32 %v51_v20, %v52_v21  ;;  %279 = vmatpush.bf16.msra.mxu1 %v413_v50  ;;  %v186_v17 = vld [vmem:[%s629_s4] sm:$0x1]  ;;  %s308_s4 = sshll.u32 %s633_s8, 4  ;;  %s319_s8 = sshll.u32 %s634_s9, 4  ;;  %s309_s4 = int_to_ptr.hbm [resolvable:$true] %s308_s4  ;;  %s320_s8 = int_to_ptr.hbm [resolvable:$true] %s319_s8 }
  0x13   :  { %v199_v21 = vld [vmem:[%s630_s5] sm:$0x1]  ;;  %s295_s5 = sshll.u32 %s501_s28, 4  ;;  %s296_s5 = int_to_ptr.vmem [resolvable:$true] %s295_s5 }
  0x14   :  { %v54_v24 = vmax.f32 %v53_v23, 0.0 }
  0x16   :  { %153 = vmatpush.bf16.msra.mxu0 %v403_v22  ;;  %v56_v26 = vadd.f32 1e-05, %v54_v24  ;;  %280 = vmatpush.bf16.msra.mxu1 %v412_v51 }
  0x18   :  { %420 = vrsqrt.f32 %v56_v26  ;;  %vm63_vm0 = vweird.f32 %v56_v26 }
  0x1a   :  { %154 = vmatpush.bf16.msra.mxu0 %v402_v25  ;;  %281 = vmatpush.bf16.msra.mxu1 %v411_v55 }
  0x1e   :  { %155 = vmatpush.bf16.msra.mxu0 %v401_v27  ;;  %v421_v28 = vpop.eup %420  ;;  %282 = vmatpush.bf16.msra.mxu1 %v410_v60 }
  0x1f   :  { %v58_v29 = vmul.f32 %v421_v28, %v56_v26  ;;  %vm64_vm1 = vweird.f32 %v421_v28 }
  0x20   :  { %vm65_vm2 = vmor %vm63_vm0, %vm64_vm1 }
  0x21   :  { %v59_v30 = vmul.f32 %v421_v28, %v58_v29 }
  0x22   :  { %283 = vmatpush.bf16.msra.mxu1 %v409_v1 }
  0x23   :  { %v60_v31 = vmul.f32 0.5, %v59_v30 }
  0x25   :  { %v61_v32 = vsub.f32 1.5, %v60_v31 }
  0x27   :  { %v62_v34 = vmul.f32 %v421_v28, %v61_v32 }
  0x29   :  { %v66_v35 = vsel %vm65_vm2, %v421_v28, %v62_v34 }
  0x2a   :  { %v67_v36 = vmul.f32 %v66_v35, %v55_v33 }
  0x2c   :  { %v69_v38 = vmul.f32 %v67_v36, %v50_v19  ;;  %v72_v39 = vperm.slane %v67_v36, 0 }
  0x2e   :  { %v70_v40 = vsub.f32 %v68_v37, %v69_v38  ;;  %v74_v41 = vmul.f32 %v72_v39, %v36_v2 }
  0x30   :  { %v76_v42 = vperm.slane %v70_v40, 0 }
  0x32   :  { %v78_v43 = vadd.f32 %v76_v42, %v74_v41 }
  0x34   :  { %vm79_vm3 = vcmp.ge.f32.partialorder %v78_v43, 0.0  ;;  %v80_v44 = vmul.f32 0.1, %v78_v43 }
  0x36   :  { %v81_v45 = vsel %vm79_vm3, %v78_v43, %v80_v44 }
  0x37   :  { %v83_v46 = vpack.c.bf16 %v81_v45, %v81_v45 }
  0x39   :  { %156 = vmatmul.bf16.vlgmr.msra.gmra.mxu0 %v83_v46 }
  0xb6   :  { %v157_v52 = vpop.f32.mrf.mxu0 }
  0xb7   :  { %v168_v53 = vrot.slane %v157_v52, 4  ;;  %v174_v54 = vmul.f32 %v157_v52, %v157_v52  ;;  %167 = vst [vmem:[#allocation3] sm:$0xff] %v157_v52 }
  0xb8   :  { %300 = dma.vmem_to_hbm [thread:$0]  %s296_s5, 128, %s298_s1, [#allocation4]  }
  0xb9   :  { %v169_v56 = vadd.f32 %v168_v53, %v157_v52  ;;  %v175_v57 = vrot.slane %v174_v54, 4 }
  0xbb   :  { %v170_v58 = vrot.slane %v169_v56, 2  ;;  %v176_v59 = vadd.f32 %v175_v57, %v174_v54 }
  0xbd   :  { %v171_v61 = vadd.f32 %v170_v58, %v169_v56  ;;  %v177_v62 = vrot.slane %v176_v59, 2 }
  0xbe   :  { %v159_v63 = vpop.f32.mrf.mxu0 }
  0xbf   :  { %v178_v0 = vadd.f32 %v177_v62, %v176_v59  ;;  %v172_v2 = vrot.slane %v171_v61, 1 }
  0xc1   :  { %v179_v3 = vrot.slane %v178_v0, 1  ;;  %v173_v4 = vadd.f32 %v172_v2, %v171_v61 }
  0xc3   :  { %v180_v5 = vadd.f32 %v179_v3, %v178_v0  ;;  %v181_v6 = vmul.f32 0.125, %v173_v4 }
  0xc5   :  { %v182_v7 = vmul.f32 0.125, %v180_v5  ;;  %v183_v8 = vmul.f32 %v181_v6, %v181_v6 }
  0xc7   :  { %v184_v9 = vsub.f32 %v182_v7, %v183_v8 }
  0xc9   :  { %v185_v10 = vmax.f32 %v184_v9, 0.0 }
  0xcb   :  { %v187_v11 = vadd.f32 1e-05, %v185_v10 }
  0xcd   :  { %422 = vrsqrt.f32 %v187_v11  ;;  %vm194_vm5 = vweird.f32 %v187_v11 }
  0xd3   :  { %v423_v12 = vpop.eup %422 }
  0xd4   :  { %v189_v13 = vmul.f32 %v423_v12, %v187_v11  ;;  %vm195_vm4 = vweird.f32 %v423_v12 }
  0xd5   :  { %vm196_vm6 = vmor %vm194_vm5, %vm195_vm4 }
  0xd6   :  { %v190_v14 = vmul.f32 %v423_v12, %v189_v13 }
  0xd8   :  { %v191_v15 = vmul.f32 0.5, %v190_v14 }
  0xda   :  { %v192_v16 = vsub.f32 1.5, %v191_v15 }
  0xdc   :  { %v193_v18 = vmul.f32 %v423_v12, %v192_v16 }
  0xde   :  { %v197_v19 = vsel %vm196_vm6, %v423_v12, %v193_v18 }
  0xdf   :  { %v198_v20 = vmul.f32 %v197_v19, %v186_v17 }
  0xe1   :  { %v200_v22 = vmul.f32 %v198_v20, %v181_v6  ;;  %v203_v23 = vperm.slane %v198_v20, 0 }
  0xe3   :  { %v201_v24 = vsub.f32 %v199_v21, %v200_v22  ;;  %v205_v25 = vmul.f32 %v203_v23, %v157_v52 }
  0xe5   :  { %v207_v26 = vperm.slane %v201_v24, 0 }
  0xe7   :  { %v209_v27 = vadd.f32 %v207_v26, %v205_v25 }
  0xe9   :  { %v211_v28 = vpack.c.bf16 %v209_v27, %v209_v27  ;;  %210 = vst [vmem:[#allocation5] sm:$0xff] %v209_v27 }
  0xea   :  { %311 = dma.vmem_to_hbm [thread:$0]  %s307_s27, 128, %s309_s4, [#allocation6]  }
  0xeb   :  { %284 = vmatmul.bf16.vlgmr.msra.gmra.mxu1 %v211_v28 }
 0x168   :  { %v285_v29 = vpop.f32.mrf.mxu1 }
 0x169   :  { %289 = vst [vmem:[#allocation7] sm:$0xff] %v285_v29 }
 0x16a   :  { %322 = dma.vmem_to_hbm [thread:$0]  %s318_s10, 128, %s320_s8, [#allocation6]  }
 0x170   :  { %v287_v30 = vpop.f32.mrf.mxu1 }
 0x171   :  { %496 = dma.done.wait [#allocation4], 128  }
 0x172   :  { %497 = vsyncadd [#allocation4], 4294967168 }
 0x173   :  { %498 = dma.done.wait [#allocation6], 256  }
 0x174   :  { %499 = vsyncadd [#allocation6], 4294967040 }
 0x175   :  { %335 = vsyncpa [#allocation4], 1 }
 0x176   :  { %336 = vsyncpa [#allocation6], 1 }

</bundles_post_ra>
